<compile_context>
chip_gen: v5e
topology: v5e:2x2
jax: 0.10.0
libtpu: 0.0.40
codegen_flags: <defaults>
</compile_context>

<pallas_src>
import functools

import jax
import jax.numpy as jnp
from jax import lax
from jax.experimental import pallas as pl
from jax.experimental.pallas import tpu as pltpu


# ----------------------------------------------------------------------------
# Fused kernel: per (batch, queryL-tile) grid step.
#
#   srcT  = Wc @ context                         (idf, sourceL)
#   attnT = softmax_over_sourceL(srcT^T @ x)     (sourceL, TQ)
#   wctx  = srcT @ attnT                         (idf, TQ)
#   satt  = softmax_over_channels(Wsv @ (x * s)) (idf, TQ)
#   wsent = s * satt                             (idf, TQ)
#
# All arrays keep queryL as the last (lane) axis -> lane-dense stores.
# ----------------------------------------------------------------------------
def _fused_kernel(x_ref, ctx_ref, wc_ref, slin_ref, wsv_ref,
                  wctx_ref, wsent_ref, wattn_ref, satt_ref):
    # x_ref    : (1, idf, TQ)       image features (channel-major, queryL last)
    # ctx_ref  : (1, cdf, sourceL)  word vectors
    # wc_ref   : (idf, cdf)         conv_context weight
    # slin_ref : (1, idf, 1)        linear(sentence), precomputed in the wrapper
    # wsv_ref  : (idf, idf)         conv_sentence_vis weight
    x = x_ref[0]                                            # (idf, TQ)
    ctx = ctx_ref[0]                                        # (cdf, sourceL)
    wc = wc_ref[...]                                        # (idf, cdf)
    s_col = slin_ref[0]                                     # (idf, 1)
    wsv = wsv_ref[...]                                      # (idf, idf)

    # ---- word / context attention path ----
    # sourceT = conv_context(context): (idf, sourceL)
    srcT = jnp.dot(wc, ctx, preferred_element_type=jnp.float32)

    # attn^T[s, q] = sum_i srcT[i, s] * x[i, q]  -> (sourceL, TQ)
    attnT = lax.dot_general(
        srcT, x,
        dimension_numbers=(((0,), (0,)), ((), ())),
        preferred_element_type=jnp.float32,
    )
    # softmax over sourceL (== dim 1 of the PyTorch 2D softmax)
    attnT = attnT - jnp.max(attnT, axis=0, keepdims=True)
    e = jnp.exp(attnT)
    p = e * pl.reciprocal(jnp.sum(e, axis=0, keepdims=True), approx=True)

    wattn_ref[0] = p
    # weightedContext = sourceT @ attn -> (idf, TQ)
    wctx_ref[0] = jnp.dot(srcT, p, preferred_element_type=jnp.float32)

    # ---- sentence / global attention path ----
    sv = jnp.dot(wsv, x * s_col, preferred_element_type=jnp.float32)  # (idf, TQ)
    # softmax over channel dim (== dim 1 of NCHW)
    sv = sv - jnp.max(sv, axis=0, keepdims=True)
    es = jnp.exp(sv)
    satt = es * pl.reciprocal(jnp.sum(es, axis=0, keepdims=True), approx=True)

    satt_ref[0] = satt
    wsent_ref[0] = s_col * satt


def _choose_query_tile(queryL, idf, sourceL):
    """Largest lane-dense queryL tile that keeps double-buffered blocks small.

    Budget is conservative (~8 MiB live block bytes) so enlarged blocks stay
    well inside v7x's 64 MiB VMEM / 32 MiB scoped default as well as v5e/v6e.
    """
    budget_bytes = 8 * 1024 * 1024
    per_col_bytes = (5 * idf + sourceL) * 4 * 2   # x + 4 outputs, double-buffered
    for t in (2048, 1024, 512, 256, 128):
        if queryL % t == 0 and t * per_col_bytes <= budget_bytes:
            return t
    return queryL  # small / irregular queryL: take the whole extent


@functools.partial(jax.jit, static_argnames=())
def gl_attention_general(x, sentence, context, params):
    """Forward pass of GLAttentionGeneral.

    x        : (B, idf, ih, iw)   float32  (NCHW, like PyTorch)
    sentence : (B, 100)           float32
    context  : (B, cdf, sourceL)  float32
    returns  : (weightedContext (B,idf,ih,iw), weightedSentence (B,idf,ih,iw),
                word_attn (B,sourceL,ih,iw),   sent_att (B,idf,ih,iw))
    """
    B, idf, ih, iw = x.shape
    queryL = ih * iw
    cdf, sourceL = context.shape[1], context.shape[2]

    # --- glue: views only (no transposes, no data movement) ---
    x3 = x.reshape(B, idf, queryL)                                  # (B, idf, queryL)

    # Hoisted Linear(100, idf): tiny matmul, done once in XLA for all batches.
    s_lin = sentence @ params["w_linear"].T + params["b_linear"]    # (B, idf)
    s_col = s_lin[:, :, None]                                       # (B, idf, 1)

    tq = _choose_query_tile(queryL, idf, sourceL)
    nq = queryL // tq
    grid = (B, nq)

    wctx, wsent, wattn, satt = pl.pallas_call(
        _fused_kernel,
        out_shape=(
            jax.ShapeDtypeStruct((B, idf, queryL), jnp.float32),
            jax.ShapeDtypeStruct((B, idf, queryL), jnp.float32),
            jax.ShapeDtypeStruct((B, sourceL, queryL), jnp.float32),
            jax.ShapeDtypeStruct((B, idf, queryL), jnp.float32),
        ),
        grid_spec=pltpu.PrefetchScalarGridSpec(
            num_scalar_prefetch=0,
            grid=grid,
            in_specs=[
                pl.BlockSpec((1, idf, tq), lambda b, q: (b, 0, q)),
                pl.BlockSpec((1, cdf, sourceL), lambda b, q: (b, 0, 0)),
                pl.BlockSpec((idf, cdf), lambda b, q: (0, 0)),
                pl.BlockSpec((1, idf, 1), lambda b, q: (b, 0, 0)),
                pl.BlockSpec((idf, idf), lambda b, q: (0, 0)),
            ],
            out_specs=[
                pl.BlockSpec((1, idf, tq), lambda b, q: (b, 0, q)),
                pl.BlockSpec((1, idf, tq), lambda b, q: (b, 0, q)),
                pl.BlockSpec((1, sourceL, tq), lambda b, q: (b, 0, q)),
                pl.BlockSpec((1, idf, tq), lambda b, q: (b, 0, q)),
            ],
        ),
        compiler_params=pltpu.CompilerParams(
            dimension_semantics=("parallel", "parallel")),
    )(x3, context, params["w_context"], s_col, params["w_sentence_vis"])

    # --- glue: pure reshapes back to NCHW (no transposes needed) ---
    weightedContext = wctx.reshape(B, idf, ih, iw)
    weightedSentence = wsent.reshape(B, idf, ih, iw)
    word_attn = wattn.reshape(B, sourceL, ih, iw)
    sent_att = satt.reshape(B, idf, ih, iw)
    return weightedContext, weightedSentence, word_attn, sent_att


def _reference(x, sentence, context, params):
    """Pure-JAX reference mirroring the PyTorch forward, for verification."""
    B, idf, ih, iw = x.shape
    queryL = ih * iw
    sourceL = context.shape[2]
    target = x.reshape(B, idf, queryL)
    targetT = jnp.transpose(target, (0, 2, 1))
    sourceT = jnp.einsum("oc,bcs->bos", params["w_context"], context)
    attn = jnp.einsum("bqi,bis->bqs", targetT, sourceT)
    attn = jax.nn.softmax(attn.reshape(B * queryL, sourceL), axis=1)
    attn = jnp.transpose(attn.reshape(B, queryL, sourceL), (0, 2, 1))
    wctx = jnp.einsum("bis,bsq->biq", sourceT, attn).reshape(B, idf, ih, iw)
    word_attn = attn.reshape(B, sourceL, ih, iw)
    s_lin = sentence @ params["w_linear"].T + params["b_linear"]
    s_bc = s_lin.reshape(B, idf, 1, 1)
    sv = x * s_bc
    sv = jnp.einsum("oc,bchw->bohw", params["w_sentence_vis"], sv)
    satt = jax.nn.softmax(sv, axis=1)
    wsent = s_bc * satt
    return wctx, wsent, word_attn, satt


if __name__ == "__main__":
    # Small deterministic example consistent with the module:
    #   input: (B, idf, ih, iw), sentence: (B, 100), context: (B, cdf, sourceL)
    B, idf, cdf, ih, iw, sourceL, hdim = 2, 32, 16, 16, 16, 16, 100
    key = jax.random.PRNGKey(0)
    k = jax.random.split(key, 7)

    x = jax.random.normal(k[0], (B, idf, ih, iw), dtype=jnp.float32)
    sentence = jax.random.normal(k[1], (B, hdim), dtype=jnp.float32)
    context = jax.random.normal(k[2], (B, cdf, sourceL), dtype=jnp.float32)

    params = {
        # conv_context: Conv2d(cdf, idf, 1, bias=False) -> weight (idf, cdf)
        "w_context": 0.1 * jax.random.normal(k[3], (idf, cdf), dtype=jnp.float32),
        # conv_sentence_vis: Conv2d(idf, idf, 1, bias=False) -> weight (idf, idf)
        "w_sentence_vis": 0.1 * jax.random.normal(k[4], (idf, idf), dtype=jnp.float32),
        # linear: Linear(100, idf) -> weight (idf, 100), bias (idf,)
        "w_linear": 0.1 * jax.random.normal(k[5], (idf, hdim), dtype=jnp.float32),
        "b_linear": 0.1 * jax.random.normal(k[6], (idf,), dtype=jnp.float32),
    }

    outs = gl_attention_general(x, sentence, context, params)
    outs = jax.block_until_ready(outs)

    refs = _reference(x, sentence, context, params)
    # Slightly loosened tolerance: softmax denominators use the EUP
    # approximate reciprocal (pl.reciprocal(approx=True)) per perf guidance.
    for o, r in zip(outs, refs):
        assert o.shape == r.shape, (o.shape, r.shape)
        err = float(jnp.max(jnp.abs(o - r)))
        assert jnp.allclose(o, r, atol=2e-3, rtol=2e-3), err

    print("KERNEL_OK")
</pallas_src>

<mosaic_0001>
module attributes {stable_mosaic.version = 11 : i64} {
  func.func @_fused_kernel(%arg0: i32, %arg1: i32, %arg2: memref<1x32x256xf32, #tpu.memory_space<vmem>>, %arg3: memref<1x16x16xf32, #tpu.memory_space<vmem>>, %arg4: memref<32x16xf32, #tpu.memory_space<vmem>>, %arg5: memref<1x32x1xf32, #tpu.memory_space<vmem>>, %arg6: memref<32x32xf32, #tpu.memory_space<vmem>>, %arg7: memref<1x32x256xf32, #tpu.memory_space<vmem>>, %arg8: memref<1x32x256xf32, #tpu.memory_space<vmem>>, %arg9: memref<1x16x256xf32, #tpu.memory_space<vmem>>, %arg10: memref<1x32x256xf32, #tpu.memory_space<vmem>>) attributes {dimension_semantics = [#tpu.dimension_semantics<parallel>, #tpu.dimension_semantics<parallel>], iteration_bounds = array<i64: 2, 1>, scalar_prefetch = 0 : i64, scratch_operands = 0 : i64, tpu.core_type = #tpu.core_type<tc>, window_params = [{transform_indices = @transform_0, window_bounds = array<i64: 1, 32, 256>}, {transform_indices = @transform_1, window_bounds = array<i64: 1, 16, 16>}, {pipeline_mode = #tpu.pipeline_mode<synchronous>, transform_indices = @transform_2, window_bounds = array<i64: 32, 16>}, {transform_indices = @transform_3, window_bounds = array<i64: 1, 32, 1>}, {pipeline_mode = #tpu.pipeline_mode<synchronous>, transform_indices = @transform_4, window_bounds = array<i64: 32, 32>}, {transform_indices = @transform_5, window_bounds = array<i64: 1, 32, 256>}, {transform_indices = @transform_6, window_bounds = array<i64: 1, 32, 256>}, {transform_indices = @transform_7, window_bounds = array<i64: 1, 16, 256>}, {transform_indices = @transform_8, window_bounds = array<i64: 1, 32, 256>}]} {
    %c0 = arith.constant 0 : index
    %c0_0 = arith.constant 0 : index
    %c0_1 = arith.constant 0 : index
    %0 = vector.load %arg2[%c0, %c0_0, %c0_1] : memref<1x32x256xf32, #tpu.memory_space<vmem>>, vector<1x32x256xf32>
    %1 = vector.shape_cast %0 : vector<1x32x256xf32> to vector<32x256xf32>
    %c0_2 = arith.constant 0 : index
    %c0_3 = arith.constant 0 : index
    %c0_4 = arith.constant 0 : index
    %2 = vector.load %arg3[%c0_2, %c0_3, %c0_4] : memref<1x16x16xf32, #tpu.memory_space<vmem>>, vector<1x16x16xf32>
    %3 = vector.shape_cast %2 : vector<1x16x16xf32> to vector<16x16xf32>
    %c0_5 = arith.constant 0 : index
    %c0_6 = arith.constant 0 : index
    %4 = vector.load %arg4[%c0_5, %c0_6] : memref<32x16xf32, #tpu.memory_space<vmem>>, vector<32x16xf32>
    %c0_7 = arith.constant 0 : index
    %c0_8 = arith.constant 0 : index
    %c0_9 = arith.constant 0 : index
    %5 = vector.load %arg5[%c0_7, %c0_8, %c0_9] : memref<1x32x1xf32, #tpu.memory_space<vmem>>, vector<1x32x1xf32>
    %6 = vector.shape_cast %5 : vector<1x32x1xf32> to vector<32x1xf32>
    %c0_10 = arith.constant 0 : index
    %c0_11 = arith.constant 0 : index
    %7 = vector.load %arg6[%c0_10, %c0_11] : memref<32x32xf32, #tpu.memory_space<vmem>>, vector<32x32xf32>
    %cst = arith.constant dense<0.000000e+00> : vector<32x16xf32>
    %8 = tpu.matmul %4, %3, %cst {dimension_numbers = #tpu.dot_dimension_numbers<[1], [0], [0], [1], [0, 0, 1, 1], [], []>} : vector<32x16xf32>, vector<16x16xf32>, vector<32x16xf32> -> vector<32x16xf32>
    %cst_12 = arith.constant dense<0.000000e+00> : vector<16x256xf32>
    %9 = tpu.matmul %8, %1, %cst_12 {dimension_numbers = #tpu.dot_dimension_numbers<[0], [0], [1], [1], [0, 1, 1, 1], [], []>} : vector<32x16xf32>, vector<32x256xf32>, vector<16x256xf32> -> vector<16x256xf32>
    %cst_13 = arith.constant dense<0xFF800000> : vector<256xf32>
    %10 = vector.multi_reduction <maximumf>, %9, %cst_13 [0] : vector<16x256xf32> to vector<256xf32>
    %11 = vector.shape_cast %10 : vector<256xf32> to vector<1x256xf32>
    %12 = vector.broadcast %11 : vector<1x256xf32> to vector<16x256xf32>
    %13 = arith.subf %9, %12 : vector<16x256xf32>
    %14 = math.exp %13 : vector<16x256xf32>
    %cst_14 = arith.constant dense<0.000000e+00> : vector<256xf32>
    %15 = vector.multi_reduction <add>, %14, %cst_14 [0] : vector<16x256xf32> to vector<256xf32>
    %16 = vector.shape_cast %15 : vector<256xf32> to vector<1x256xf32>
    %17 = tpu.reciprocal %16 {approx = true} : vector<1x256xf32> -> vector<1x256xf32>
    %18 = vector.broadcast %17 : vector<1x256xf32> to vector<16x256xf32>
    %19 = arith.mulf %14, %18 : vector<16x256xf32>
    %c0_15 = arith.constant 0 : index
    %c0_16 = arith.constant 0 : index
    %c0_17 = arith.constant 0 : index
    %20 = vector.load %arg9[%c0_15, %c0_16, %c0_17] : memref<1x16x256xf32, #tpu.memory_space<vmem>>, vector<1x16x256xf32>
    %21 = vector.shape_cast %20 : vector<1x16x256xf32> to vector<16x256xf32>
    %22 = vector.shape_cast %19 : vector<16x256xf32> to vector<1x16x256xf32>
    tpu.vector_store %arg9[%c0_15, %c0_16, %c0_17], %22 {strides = array<i32>} : memref<1x16x256xf32, #tpu.memory_space<vmem>>, vector<1x16x256xf32>,
    %cst_18 = arith.constant dense<0.000000e+00> : vector<32x256xf32>
    %23 = tpu.matmul %8, %19, %cst_18 {dimension_numbers = #tpu.dot_dimension_numbers<[1], [0], [0], [1], [0, 0, 1, 1], [], []>} : vector<32x16xf32>, vector<16x256xf32>, vector<32x256xf32> -> vector<32x256xf32>
    %c0_19 = arith.constant 0 : index
    %c0_20 = arith.constant 0 : index
    %c0_21 = arith.constant 0 : index
    %24 = vector.load %arg7[%c0_19, %c0_20, %c0_21] : memref<1x32x256xf32, #tpu.memory_space<vmem>>, vector<1x32x256xf32>
    %25 = vector.shape_cast %24 : vector<1x32x256xf32> to vector<32x256xf32>
    %26 = vector.shape_cast %23 : vector<32x256xf32> to vector<1x32x256xf32>
    tpu.vector_store %arg7[%c0_19, %c0_20, %c0_21], %26 {strides = array<i32>} : memref<1x32x256xf32, #tpu.memory_space<vmem>>, vector<1x32x256xf32>,
    %27 = vector.broadcast %6 : vector<32x1xf32> to vector<32x256xf32>
    %28 = arith.mulf %1, %27 : vector<32x256xf32>
    %cst_22 = arith.constant dense<0.000000e+00> : vector<32x256xf32>
    %29 = tpu.matmul %7, %28, %cst_22 {dimension_numbers = #tpu.dot_dimension_numbers<[1], [0], [0], [1], [0, 0, 1, 1], [], []>} : vector<32x32xf32>, vector<32x256xf32>, vector<32x256xf32> -> vector<32x256xf32>
    %cst_23 = arith.constant dense<0xFF800000> : vector<256xf32>
    %30 = vector.multi_reduction <maximumf>, %29, %cst_23 [0] : vector<32x256xf32> to vector<256xf32>
    %31 = vector.shape_cast %30 : vector<256xf32> to vector<1x256xf32>
    %32 = vector.broadcast %31 : vector<1x256xf32> to vector<32x256xf32>
    %33 = arith.subf %29, %32 : vector<32x256xf32>
    %34 = math.exp %33 : vector<32x256xf32>
    %cst_24 = arith.constant dense<0.000000e+00> : vector<256xf32>
    %35 = vector.multi_reduction <add>, %34, %cst_24 [0] : vector<32x256xf32> to vector<256xf32>
    %36 = vector.shape_cast %35 : vector<256xf32> to vector<1x256xf32>
    %37 = tpu.reciprocal %36 {approx = true} : vector<1x256xf32> -> vector<1x256xf32>
    %38 = vector.broadcast %37 : vector<1x256xf32> to vector<32x256xf32>
    %39 = arith.mulf %34, %38 : vector<32x256xf32>
    %c0_25 = arith.constant 0 : index
    %c0_26 = arith.constant 0 : index
    %c0_27 = arith.constant 0 : index
    %40 = vector.load %arg10[%c0_25, %c0_26, %c0_27] : memref<1x32x256xf32, #tpu.memory_space<vmem>>, vector<1x32x256xf32>
    %41 = vector.shape_cast %40 : vector<1x32x256xf32> to vector<32x256xf32>
    %42 = vector.shape_cast %39 : vector<32x256xf32> to vector<1x32x256xf32>
    tpu.vector_store %arg10[%c0_25, %c0_26, %c0_27], %42 {strides = array<i32>} : memref<1x32x256xf32, #tpu.memory_space<vmem>>, vector<1x32x256xf32>,
    %43 = vector.broadcast %6 : vector<32x1xf32> to vector<32x256xf32>
    %44 = arith.mulf %43, %39 : vector<32x256xf32>
    %c0_28 = arith.constant 0 : index
    %c0_29 = arith.constant 0 : index
    %c0_30 = arith.constant 0 : index
    %45 = vector.load %arg8[%c0_28, %c0_29, %c0_30] : memref<1x32x256xf32, #tpu.memory_space<vmem>>, vector<1x32x256xf32>
    %46 = vector.shape_cast %45 : vector<1x32x256xf32> to vector<32x256xf32>
    %47 = vector.shape_cast %44 : vector<32x256xf32> to vector<1x32x256xf32>
    tpu.vector_store %arg8[%c0_28, %c0_29, %c0_30], %47 {strides = array<i32>} : memref<1x32x256xf32, #tpu.memory_space<vmem>>, vector<1x32x256xf32>,
    return
  }
  func.func @transform_0(%arg0: i32, %arg1: i32) -> (i32, i32, i32) {
    %c0_i32 = arith.constant 0 : i32
    %c0_i32_0 = arith.constant 0 : i32
    return %arg0, %c0_i32, %arg1 : i32, i32, i32
  }
  func.func @transform_1(%arg0: i32, %arg1: i32) -> (i32, i32, i32) {
    %c0_i32 = arith.constant 0 : i32
    %c0_i32_0 = arith.constant 0 : i32
    %c0_i32_1 = arith.constant 0 : i32
    return %arg0, %c0_i32, %c0_i32_0 : i32, i32, i32
  }
  func.func @transform_2(%arg0: i32, %arg1: i32) -> (i32, i32) {
    %c0_i32 = arith.constant 0 : i32
    %c0_i32_0 = arith.constant 0 : i32
    %c0_i32_1 = arith.constant 0 : i32
    return %c0_i32, %c0_i32_0 : i32, i32
  }
  func.func @transform_3(%arg0: i32, %arg1: i32) -> (i32, i32, i32) {
    %c0_i32 = arith.constant 0 : i32
    %c0_i32_0 = arith.constant 0 : i32
    %c0_i32_1 = arith.constant 0 : i32
    return %arg0, %c0_i32, %c0_i32_0 : i32, i32, i32
  }
  func.func @transform_4(%arg0: i32, %arg1: i32) -> (i32, i32) {
    %c0_i32 = arith.constant 0 : i32
    %c0_i32_0 = arith.constant 0 : i32
    %c0_i32_1 = arith.constant 0 : i32
    return %c0_i32, %c0_i32_0 : i32, i32
  }
  func.func @transform_5(%arg0: i32, %arg1: i32) -> (i32, i32, i32) {
    %c0_i32 = arith.constant 0 : i32
    %c0_i32_0 = arith.constant 0 : i32
    return %arg0, %c0_i32, %arg1 : i32, i32, i32
  }
  func.func @transform_6(%arg0: i32, %arg1: i32) -> (i32, i32, i32) {
    %c0_i32 = arith.constant 0 : i32
    %c0_i32_0 = arith.constant 0 : i32
    return %arg0, %c0_i32, %arg1 : i32, i32, i32
  }
  func.func @transform_7(%arg0: i32, %arg1: i32) -> (i32, i32, i32) {
    %c0_i32 = arith.constant 0 : i32
    %c0_i32_0 = arith.constant 0 : i32
    return %arg0, %c0_i32, %arg1 : i32, i32, i32
  }
  func.func @transform_8(%arg0: i32, %arg1: i32) -> (i32, i32, i32) {
    %c0_i32 = arith.constant 0 : i32
    %c0_i32_0 = arith.constant 0 : i32
    return %arg0, %c0_i32, %arg1 : i32, i32, i32
  }
}

</mosaic_0001>

<bundles_post_ra>
// kernel: gl_attention_general.1
= control target key start
LH: loop header
LB: loop body
LE: loop exit
PB: predicated region body
PF: predicated region fallthrough
CT: control target
= control target key end

     0   :  { %s1370_s27 = smov 0   ;;  %s1372_s28 = smov 0   ;;  %s1562_s0 = inlined_call_operand.vmem [shape: f32[2,32,256], index: 0, kind: input, shape index: {}]   ;;  %s1563_s1 = inlined_call_operand.vmem [shape: f32[2,16,16], index: 1, kind: input, shape index: {}]   ;;  %s1564_s2 = inlined_call_operand.vmem [shape: f32[32,16], index: 2, kind: input, shape index: {}]   ;;  %s1565_s3 = inlined_call_operand.vmem [shape: f32[2,32,1], index: 3, kind: input, shape index: {}]   ;;  %s1566_s4 = inlined_call_operand.vmem [shape: f32[32,32], index: 4, kind: input, shape index: {}]   ;;  %s1567_s5 = inlined_call_operand.vmem [shape: f32[2,32,256], index: 5, kind: output, shape index: {0}]   ;;  %s1568_s6 = inlined_call_operand.vmem [shape: f32[2,32,256], index: 6, kind: output, shape index: {1}]   ;;  %s1569_s7 = inlined_call_operand.vmem [shape: f32[2,16,256], index: 7, kind: output, shape index: {2}]   ;;  %s1570_s8 = inlined_call_operand.vmem [shape: f32[2,32,256], index: 8, kind: output, shape index: {3}]  }
   0x1   :  { %s1374_s29 = smov 0  }
   0x2 LB: > { %s31_s30 = sadd.s32 1, %s1318_s28  ;;  %p1189_p0 = scmp.ge.s32.totalorder %s1322_s29, 1  ;;  %s1322_s29 = sphi %s1374_s29, %s19_s29   ;;  %s1318_s28 = sphi %s1372_s28, %s1572_s28   ;;  %s1314_s27 = sphi %s1370_s27, %s1571_s27  }
   0x3   : > { %p33_p1 = scmp.ge.s32.totalorder %s31_s30, 2  ;;  %p316_p2 = scmp.lt.s32.totalorder %s1322_s29, 3 }
   0x5   : > { %s1574_s30 = smov (%p33_p1, %s31_s30), 0  ;;  %p317_p3 = pnand %p1189_p0, %p316_p2 }
   0x6   : > { %p396_p4 = scmp.lt.s32.totalorder (!%p317_p3), %s1314_s27, 1 }
   0x7   : > { %320 = sbr.rel (%p317_p3) target bundleno = 654 (0x28e), region = 40 }
   0xc   : > { %v1324_v0 = vmov 0   ;;  %s1576_s27 = smov (!%p396_p4, %s1314_s27), 1  ;;  %v465_v3 = vld [vmem:[%s1564_s2] sm:$0xff]  ;;  %vm477_vm0 = vcmask 130048   ;;  %v466_v4 = vld [vmem:[%s1564_s2 + $0x8] sm:$0xff]  ;;  %v467_v7 = vld [vmem:[%s1564_s2 + $0x10] sm:$0xff] }
   0xd   : > { %1265 = vset.pattern.permute.xlu1 %v1324_v0  ;;  %1266 = vset.pattern.permute.xlu2 %v1324_v0  ;;  %s1231_s9 = sshll.u32 %s1576_s27, 4  ;;  %s1232_s17 = sshll.u32 %s1576_s27, 5  ;;  %v468_v10 = vld [vmem:[%s1564_s2 + $0x18] sm:$0xff]  ;;  %v473_v28 = vld [vmem:[%s1566_s4] sm:$0xff]  ;;  %vm551_vm1 = vcmask 261120   ;;  %v474_v30 = vld [vmem:[%s1566_s4 + $0x8] sm:$0xff] }
   0xe   : > { %s409_s12 = scalar_lea.vmem %s1563_s1, %s1231_s9  ;;  %s414_s20 = scalar_lea.vmem %s1565_s3, %s1232_s17  ;;  %v475_v32 = vld [vmem:[%s1566_s4 + $0x10] sm:$0xff]  ;;  %v476_v33 = vld [vmem:[%s1566_s4 + $0x18] sm:$0xff] }
   0xf   : > { %v464_v1 = vld [vmem:[%s409_s12 + $0x8] sm:$0xff]  ;;  %v463_v2 = vld [vmem:[%s409_s12] sm:$0xff]  ;;  %v472_v5 = vld [vmem:[%s414_s20 + $0x18] sm:$0xff]  ;;  %s1419_s25 = sshll.u32 %s1576_s27, 6  ;;  %s443_s11 = scalar_lea.vmem %s1569_s7, %s1232_s17 }
  0x10   : > { %504 = vmatpush.msra.mxu0 %v464_v1  ;;  %1237 = vmatpush.msra.mxu3 %v464_v1  ;;  %v470_v6 = vld [vmem:[%s414_s20 + $0x8] sm:$0xff]  ;;  %v471_v8 = vld [vmem:[%s414_s20 + $0x10] sm:$0xff]  ;;  %v469_v9 = vld [vmem:[%s414_s20] sm:$0xff]  ;;  %s1425_s10 = scalar_lea.vmem %s1562_s0, %s1419_s25  ;;  %s1492_s22 = scalar_lea.vmem %s1570_s8, %s1419_s25 }
  0x11   : > { %749 = vperm.xlu1 %1265, %v472_v5   ;;  %739 = vperm.xlu2 %1266, %v470_v6   ;;  %v462_v13 = vld [vmem:[%s1425_s10 + $0x38] sm:$0xff]  ;;  %v460_v15 = vld [vmem:[%s1425_s10 + $0x28] sm:$0xff]  ;;  %v461_v21 = vld [vmem:[%s1425_s10 + $0x30] sm:$0xff]  ;;  %s1504_s26 = scalar_lea.vmem %s1568_s6, %s1419_s25  ;;  %s423_s12 = scalar_lea.vmem %s1567_s5, %s1419_s25 }
  0x12   : > { %505 = vmatpush.msra.mxu0 %v463_v2  ;;  %1238 = vmatpush.msra.mxu3 %v463_v2  ;;  %v458_v16 = vld [vmem:[%s1425_s10 + $0x18] sm:$0xff]  ;;  %v456_v17 = vld [vmem:[%s1425_s10 + $0x8] sm:$0xff]  ;;  %v459_v22 = vld [vmem:[%s1425_s10 + $0x20] sm:$0xff] }
  0x13   : > { %1204 = vmatmul.msk.f32.vlgmr.msra.gmra.mxu0 %vm477_vm0, %v465_v3  ;;  %1205 = vmatmul.msk.f32.vlgmr.msra.gmra.mxu3 %vm477_vm0, %v466_v4  ;;  %v457_v25 = vld [vmem:[%s1425_s10 + $0x10] sm:$0xff]  ;;  %v455_v34 = vld [vmem:[%s1425_s10] sm:$0xff] }
  0x14   : > { %593 = vmatpush.msra.mxu2 %v462_v13  ;;  %570 = vmatpush.msra.mxu1 %v461_v21 }
  0x16   : > { %594 = vmatpush.msra.mxu2 %v460_v15  ;;  %571 = vmatpush.msra.mxu1 %v459_v22 }
  0x18   : > { %595 = vmatpush.msra.mxu2 %v458_v16  ;;  %572 = vmatpush.msra.mxu1 %v457_v25 }
  0x19   : > { %744 = vperm.xlu1 %1265, %v471_v8   ;;  %734 = vperm.xlu2 %1266, %v469_v9  }
  0x1a   : > { %596 = vmatpush.msra.mxu2 %v456_v17  ;;  %573 = vmatpush.msra.mxu1 %v455_v34 }
  0x1b   : > { %1206 = vmatmul.msk.f32.gmra.mxu3 %vm477_vm0, %v467_v7 }
  0x23   : > { %1207 = vmatmul.msk.f32.gmra.mxu3 %vm477_vm0, %v468_v10 }
  0x6b   : > { %v1429_v12 = vpop.permute.xlu2 %739 }
  0x6c   : > { %v755_v24 = vmul.f32 %v1429_v12, %v458_v16  ;;  %v754_v37 = vmul.f32 %v1429_v12, %v457_v25 }
  0x73   : > { %v1441_v20 = vpop.permute.xlu2 %734 }
  0x74   : > { %v753_v26 = vmul.f32 %v1441_v20, %v456_v17  ;;  %v752_v38 = vmul.f32 %v1441_v20, %v455_v34 }
  0x83   : > { %v1427_v11 = vpop.permute.xlu1 %749 }
  0x84   : > { %v759_v14 = vmul.f32 %v1427_v11, %v462_v13  ;;  %v758_v35 = vmul.f32 %v1427_v11, %v461_v21 }
  0x86   : > { %813 = vmatpush.msrb.mxu0 %v759_v14  ;;  %784 = vmatpush.msrb.mxu2 %v758_v35 }
  0x8b   : > { %v1439_v19 = vpop.permute.xlu1 %744 }
  0x8c   : > { %v757_v23 = vmul.f32 %v1439_v19, %v460_v15  ;;  %v756_v36 = vmul.f32 %v1439_v19, %v459_v22 }
  0x8e   : > { %814 = vmatpush.msrb.mxu0 %v757_v23  ;;  %785 = vmatpush.msrb.mxu2 %v756_v36 }
  0x90   : > { %v1436_v18 = vpop.f32.mrf.mxu0  ;;  %815 = vmatpush.msrb.mxu0 %v755_v24  ;;  %786 = vmatpush.msrb.mxu2 %v754_v37 }
  0x91   : > { %519 = vxpose.xlu0.b32.start [1/4] (short) (narrow) %v1436_v18, 16 }
  0x92   : > { %816 = vmatpush.msrb.mxu0 %v753_v26  ;;  %787 = vmatpush.msrb.mxu2 %v752_v38 }
  0x93   : > { %1224 = vmatmul.msk.f32.vlgmr.msrb.gmra.mxu0 %vm551_vm1, %v473_v28 }
  0x96   : > { %v1449_v27 = vpop.f32.mrf.mxu3 }
  0x99   : > { %520 = vxpose.xlu0.b32.cont [2/4] (short) (narrow) %v1449_v27, 16 }
  0x9b   : > { %1225 = vmatmul.msk.f32.gmra.mxu0 %vm551_vm1, %v474_v30 }
  0x9e   : > { %v1456_v29 = vpop.f32.mrf.mxu3 }
  0xa1   : > { %521 = vxpose.xlu0.b32.cont [3/4] (short) (narrow) %v1456_v29, 16 }
  0xa3   : > { %1226 = vmatmul.msk.f32.gmra.mxu0 %vm551_vm1, %v475_v32 }
  0xa6   : > { %v1463_v31 = vpop.f32.mrf.mxu3 }
  0xa9   : > { %522 = vxpose.xlu0.b32.end [4/4] (short) (narrow) %v1463_v31, 16 }
  0xab   : > { %1227 = vmatmul.msk.f32.gmra.mxu0 %vm551_vm1, %v476_v33 }
 0x110   : > { %1267 = vset.pattern.permute.xlu0 %v1324_v0  ;;  %v818_v40 = vpop.f32.mrf.mxu0 }
 0x118   : > { %v821_v42 = vpop.f32.mrf.mxu0 }
 0x120   : > { %v824_v43 = vpop.f32.mrf.mxu0 }
 0x121   : > { %v839_v44 = vmax.f32 %v818_v40, %v824_v43 }
 0x128   : > { %v827_v45 = vpop.f32.mrf.mxu0 }
 0x129   : > { %v840_v46 = vmax.f32 %v821_v42, %v827_v45 }
 0x12b   : > { %v841_v47 = vmax.f32 %v839_v44, %v840_v46 }
 0x12d   : > { %v842_v48 = vrot.slane %v841_v47, 4 }
 0x12f   : > { %v843_v49 = vmax.f32 %v841_v47, %v842_v48 }
 0x131   : > { %v844_v50 = vrot.slane %v843_v49, 2 }
 0x133   : > { %v845_v51 = vmax.f32 %v843_v49, %v844_v50 }
 0x135   : > { %v535_v39 = vpop.trf.xlu0  ;;  %v846_v52 = vrot.slane %v845_v51, 1 }
 0x136   : > { %1208 = vmatmul.msk.f32.vlgmr.msra.gmra.mxu1 %vm551_vm1, %v535_v39  ;;  %1210 = vmatmul.msk.f32.vlgmr.msra.gmra.mxu2 %vm551_vm1, %v535_v39 }
 0x137   : > { %v847_v53 = vmax.f32 %v845_v51, %v846_v52 }
 0x139   : > { %v849_v54 = vsub.f32 %v818_v40, %v847_v53  ;;  %v851_v55 = vsub.f32 %v821_v42, %v847_v53  ;;  %v853_v56 = vsub.f32 %v824_v43, %v847_v53  ;;  %v855_v57 = vsub.f32 %v827_v45, %v847_v53 }
 0x13b   : > { %v858_v58 = vmul.f32 1.442695, %v849_v54  ;;  %v862_v59 = vmul.f32 1.442695, %v851_v55  ;;  %v866_v60 = vmul.f32 1.442695, %v853_v56 }
 0x13c   : > { %v870_v61 = vmul.f32 1.442695, %v855_v57 }
 0x13d   : > { %v536_v41 = vpop.trf.xlu0  ;;  %1268 = vpow2.f32 %v858_v58 }
 0x13e   : > { %1209 = vmatmul.msk.f32.gmra.mxu1 %vm551_vm1, %v536_v41  ;;  %1211 = vmatmul.msk.f32.gmra.mxu2 %vm551_vm1, %v536_v41  ;;  %1270 = vpow2.f32 %v862_v59 }
 0x13f   : > { %1272 = vpow2.f32 %v866_v60 }
 0x140   : > { %1274 = vpow2.f32 %v870_v61 }
 0x143   : > { %v1269_v62 = vpop.eup %1268 }
 0x144   : > { %v1271_v63 = vpop.eup %1270 }
 0x145   : > { %v1273_v0 = vpop.eup %1272  ;;  %v881_v1 = vadd.f32 %v1271_v63, %v1269_v62 }
 0x146   : > { %1220 = vmatmul.msk.f32.vlgmr.msrb.gmra.mxu2 %vm551_vm1, %v473_v28  ;;  %v1275_v2 = vpop.eup %1274 }
 0x147   : > { %v882_v3 = vadd.f32 %v1273_v0, %v881_v1 }
 0x149   : > { %v883_v4 = vadd.f32 %v1275_v2, %v882_v3 }
 0x14b   : > { %v884_v5 = vrot.slane %v883_v4, 4 }
 0x14d   : > { %v885_v6 = vadd.f32 %v884_v5, %v883_v4 }
 0x14e   : > { %1221 = vmatmul.msk.f32.gmra.mxu2 %vm551_vm1, %v474_v30 }
 0x14f   : > { %v886_v7 = vrot.slane %v885_v6, 2 }
 0x151   : > { %v887_v8 = vadd.f32 %v886_v7, %v885_v6 }
 0x153   : > { %v888_v9 = vrot.slane %v887_v8, 1 }
 0x155   : > { %v889_v10 = vadd.f32 %v888_v9, %v887_v8 }
 0x156   : > { %1222 = vmatmul.msk.f32.gmra.mxu2 %vm551_vm1, %v475_v32 }
 0x157   : > { %1276 = vrcp.f32 %v889_v10 }
 0x15d   : > { %v1277_v13 = vpop.eup %1276 }
 0x15e   : > { %1223 = vmatmul.msk.f32.gmra.mxu2 %vm551_vm1, %v476_v33  ;;  %v893_v14 = vmul.f32 %v1277_v13, %v1269_v62  ;;  %v895_v15 = vmul.f32 %v1277_v13, %v1271_v63  ;;  %v897_v16 = vmul.f32 %v1277_v13, %v1273_v0  ;;  %v899_v17 = vmul.f32 %v1277_v13, %v1275_v2 }
 0x160   : > { %901 = vst [vmem:[%s1492_s22 + $0x8] sm:$0xff] %v893_v14  ;;  %v909_v21 = vmul.f32 %v893_v14, %v1441_v20  ;;  %v911_v22 = vmul.f32 %v895_v15, %v1429_v12  ;;  %v913_v23 = vmul.f32 %v897_v16, %v1439_v19  ;;  %v915_v24 = vmul.f32 %v899_v17, %v1427_v11 }
 0x161   : > { %903 = vst [vmem:[%s1492_s22 + $0x18] sm:$0xff] %v895_v15 }
 0x162   : > { %905 = vst [vmem:[%s1492_s22 + $0x28] sm:$0xff] %v897_v16 }
 0x163   : > { %907 = vst [vmem:[%s1492_s22 + $0x38] sm:$0xff] %v899_v17 }
 0x164   : > { %917 = vst [vmem:[%s1504_s26 + $0x8] sm:$0xff] %v909_v21 }
 0x165   : > { %919 = vst [vmem:[%s1504_s26 + $0x18] sm:$0xff] %v911_v22 }
 0x166   : > { %921 = vst [vmem:[%s1504_s26 + $0x28] sm:$0xff] %v913_v23 }
 0x167   : > { %923 = vst [vmem:[%s1504_s26 + $0x38] sm:$0xff] %v915_v24 }
 0x1b3   : > { %v575_v25 = vpop.f32.mrf.mxu1 }
 0x1b9   : > { %v598_v26 = vpop.f32.mrf.mxu2 }
 0x1bb   : > { %v578_v28 = vpop.f32.mrf.mxu1 }
 0x1bc   : > { %v604_v30 = vmax.f32 %v575_v25, %v578_v28 }
 0x1be   : > { %v605_v32 = vrot.slane %v604_v30, 4 }
 0x1c0   : > { %v606_v33 = vmax.f32 %v604_v30, %v605_v32 }
 0x1c1   : > { %v601_v34 = vpop.f32.mrf.mxu2 }
 0x1c2   : > { %v607_v35 = vrot.slane %v606_v33, 2  ;;  %v611_v36 = vmax.f32 %v598_v26, %v601_v34 }
 0x1c4   : > { %v608_v37 = vmax.f32 %v606_v33, %v607_v35  ;;  %v612_v38 = vrot.slane %v611_v36, 4 }
 0x1c6   : > { %v609_v39 = vrot.slane %v608_v37, 1  ;;  %v613_v40 = vmax.f32 %v611_v36, %v612_v38 }
 0x1c8   : > { %v610_v41 = vmax.f32 %v608_v37, %v609_v39  ;;  %v614_v42 = vrot.slane %v613_v40, 2 }
 0x1c9   : > { %v1512_v43 = vpop.f32.mrf.mxu2 }
 0x1ca   : > { %v618_v44 = vsub.f32 %v575_v25, %v610_v41  ;;  %v620_v45 = vsub.f32 %v578_v28, %v610_v41  ;;  %v615_v46 = vmax.f32 %v613_v40, %v614_v42 }
 0x1cc   : > { %v622_v47 = vmul.f32 1.442695, %v618_v44  ;;  %v626_v48 = vmul.f32 1.442695, %v620_v45  ;;  %v616_v49 = vrot.slane %v615_v46, 1 }
 0x1ce   : > { %1278 = vpow2.f32 %v622_v47  ;;  %v617_v50 = vmax.f32 %v615_v46, %v616_v49 }
 0x1cf   : > { %1280 = vpow2.f32 %v626_v48 }
 0x1d0   : > { %v619_v51 = vsub.f32 %v598_v26, %v617_v50  ;;  %v621_v52 = vsub.f32 %v601_v34, %v617_v50 }
 0x1d1   : > { %v792_v53 = vpop.f32.mrf.mxu2 }
 0x1d2   : > { %v624_v54 = vmul.f32 1.442695, %v619_v51  ;;  %v628_v55 = vmul.f32 1.442695, %v621_v52 }
 0x1d4   : > { %v1279_v56 = vpop.eup %1278  ;;  %1282 = vpow2.f32 %v624_v54 }
 0x1d5   : > { %v1281_v57 = vpop.eup %1280  ;;  %1284 = vpow2.f32 %v628_v55 }
 0x1d6   : > { %v630_v58 = vadd.f32 %v1281_v57, %v1279_v56 }
 0x1d8   : > { %v631_v59 = vrot.slane %v630_v58, 4 }
 0x1d9   : > { %v795_v60 = vpop.f32.mrf.mxu2 }
 0x1da   : > { %v1283_v61 = vpop.eup %1282  ;;  %v632_v62 = vadd.f32 %v631_v59, %v630_v58  ;;  %v830_v5 = vmax.f32 %v1512_v43, %v795_v60 }
 0x1db   : > { %v1285_v63 = vpop.eup %1284 }
 0x1dc   : > { %v637_v0 = vadd.f32 %v1285_v63, %v1283_v61  ;;  %v633_v1 = vrot.slane %v632_v62, 2 }
 0x1de   : > { %v638_v2 = vrot.slane %v637_v0, 4  ;;  %v634_v3 = vadd.f32 %v633_v1, %v632_v62 }
 0x1e0   : > { %v639_v4 = vadd.f32 %v638_v2, %v637_v0  ;;  %v635_v6 = vrot.slane %v634_v3, 1 }
 0x1e1   : > { %v798_v7 = vpop.f32.mrf.mxu2 }
 0x1e2   : > { %v831_v8 = vmax.f32 %v792_v53, %v798_v7  ;;  %v636_v9 = vadd.f32 %v635_v6, %v634_v3  ;;  %v640_v10 = vrot.slane %v639_v4, 2 }
 0x1e4   : > { %v832_v13 = vmax.f32 %v830_v5, %v831_v8  ;;  %1286 = vrcp.f32 %v636_v9  ;;  %v641_v14 = vadd.f32 %v640_v10, %v639_v4 }
 0x1e6   : > { %v833_v15 = vrot.slane %v832_v13, 4  ;;  %v642_v16 = vrot.slane %v641_v14, 1 }
 0x1e8   : > { %v834_v17 = vmax.f32 %v832_v13, %v833_v15  ;;  %v643_v21 = vadd.f32 %v642_v16, %v641_v14 }
 0x1ea   : > { %v1287_v22 = vpop.eup %1286  ;;  %v835_v23 = vrot.slane %v834_v17, 2  ;;  %1288 = vrcp.f32 %v643_v21 }
 0x1eb   : > { %v648_v24 = vmul.f32 %v1287_v22, %v1281_v57  ;;  %v646_v25 = vmul.f32 %v1287_v22, %v1279_v56 }
 0x1ec   : > { %v836_v26 = vmax.f32 %v834_v17, %v835_v23 }
 0x1ed   : > { %652 = vst [vmem:[%s443_s11 + $0x10] sm:$0xff] %v648_v24  ;;  %680 = vmatpush.msrb.mxu3 %v648_v24 }
 0x1ee   : > { %v837_v28 = vrot.slane %v836_v26, 1  ;;  %650 = vst [vmem:[%s443_s11] sm:$0xff] %v646_v25 }
 0x1ef   : > { %681 = vmatpush.msrb.mxu3 %v646_v25 }
 0x1f0   : > { %v1289_v30 = vpop.eup %1288  ;;  %v838_v32 = vmax.f32 %v836_v26, %v837_v28  ;;  %1212 = vmatmul.msk.f32.vlgmr.msrb.gmra.mxu3 %vm477_vm0, %v1436_v18 }
 0x1f1   : > { %v649_v33 = vmul.f32 %v1289_v30, %v1285_v63  ;;  %v647_v34 = vmul.f32 %v1289_v30, %v1283_v61 }
 0x1f2   : > { %v848_v35 = vsub.f32 %v1512_v43, %v838_v32  ;;  %v850_v36 = vsub.f32 %v792_v53, %v838_v32  ;;  %v852_v37 = vsub.f32 %v795_v60, %v838_v32  ;;  %v854_v38 = vsub.f32 %v798_v7, %v838_v32 }
 0x1f3   : > { %653 = vst [vmem:[%s443_s11 + $0x18] sm:$0xff] %v649_v33  ;;  %709 = vmatpush.msrb.mxu1 %v649_v33 }
 0x1f4   : > { %v856_v39 = vmul.f32 1.442695, %v848_v35  ;;  %v860_v40 = vmul.f32 1.442695, %v850_v36  ;;  %v864_v41 = vmul.f32 1.442695, %v852_v37 }
 0x1f5   : > { %v868_v42 = vmul.f32 1.442695, %v854_v38  ;;  %651 = vst [vmem:[%s443_s11 + $0x8] sm:$0xff] %v647_v34  ;;  %710 = vmatpush.msrb.mxu1 %v647_v34 }
 0x1f6   : > { %1290 = vpow2.f32 %v856_v39  ;;  %1216 = vmatmul.msk.f32.vlgmr.msrb.gmra.mxu1 %vm477_vm0, %v1436_v18 }
 0x1f7   : > { %1292 = vpow2.f32 %v860_v40 }
 0x1f8   : > { %1294 = vpow2.f32 %v864_v41  ;;  %1213 = vmatmul.msk.f32.gmra.mxu3 %vm477_vm0, %v1449_v27 }
 0x1f9   : > { %1296 = vpow2.f32 %v868_v42 }
 0x1fc   : > { %v1291_v43 = vpop.eup %1290 }
 0x1fd   : > { %v1293_v44 = vpop.eup %1292 }
 0x1fe   : > { %v1295_v45 = vpop.eup %1294  ;;  %v872_v46 = vadd.f32 %v1293_v44, %v1291_v43  ;;  %1217 = vmatmul.msk.f32.gmra.mxu1 %vm477_vm0, %v1449_v27 }
 0x1ff   : > { %v1297_v47 = vpop.eup %1296 }
 0x200   : > { %v873_v48 = vadd.f32 %v1295_v45, %v872_v46  ;;  %1214 = vmatmul.msk.f32.gmra.mxu3 %vm477_vm0, %v1456_v29 }
 0x202   : > { %v874_v49 = vadd.f32 %v1297_v47, %v873_v48 }
 0x204   : > { %v875_v18 = vrot.slane %v874_v49, 4 }
 0x206   : > { %v876_v50 = vadd.f32 %v875_v18, %v874_v49  ;;  %1218 = vmatmul.msk.f32.gmra.mxu1 %vm477_vm0, %v1456_v29 }
 0x208   : > { %v877_v51 = vrot.slane %v876_v50, 2  ;;  %1215 = vmatmul.msk.f32.gmra.mxu3 %vm477_vm0, %v1463_v31 }
 0x20a   : > { %v878_v52 = vadd.f32 %v877_v51, %v876_v50 }
 0x20c   : > { %v879_v27 = vrot.slane %v878_v52, 1 }
 0x20e   : > { %v880_v53 = vadd.f32 %v879_v27, %v878_v52  ;;  %1219 = vmatmul.msk.f32.gmra.mxu1 %vm477_vm0, %v1463_v31 }
 0x210   : > { %1298 = vrcp.f32 %v880_v53 }
 0x216   : > { %v1299_v54 = vpop.eup %1298 }
 0x217   : > { %v892_v55 = vmul.f32 %v1299_v54, %v1291_v43  ;;  %v894_v29 = vmul.f32 %v1299_v54, %v1293_v44  ;;  %v896_v56 = vmul.f32 %v1299_v54, %v1295_v45  ;;  %v898_v57 = vmul.f32 %v1299_v54, %v1297_v47 }
 0x219   : > { %900 = vst [vmem:[%s1492_s22] sm:$0xff] %v892_v55  ;;  %v908_v58 = vmul.f32 %v892_v55, %v1441_v20  ;;  %v910_v59 = vmul.f32 %v894_v29, %v1429_v12  ;;  %v912_v60 = vmul.f32 %v896_v56, %v1439_v19  ;;  %v914_v31 = vmul.f32 %v898_v57, %v1427_v11 }
 0x21a   : > { %902 = vst [vmem:[%s1492_s22 + $0x10] sm:$0xff] %v894_v29 }
 0x21b   : > { %904 = vst [vmem:[%s1492_s22 + $0x20] sm:$0xff] %v896_v56 }
 0x21c   : > { %906 = vst [vmem:[%s1492_s22 + $0x30] sm:$0xff] %v898_v57 }
 0x21d   : > { %916 = vst [vmem:[%s1504_s26] sm:$0xff] %v908_v58 }
 0x21e   : > { %918 = vst [vmem:[%s1504_s26 + $0x10] sm:$0xff] %v910_v59 }
 0x21f   : > { %920 = vst [vmem:[%s1504_s26 + $0x20] sm:$0xff] %v912_v60 }
 0x220   : > { %922 = vst [vmem:[%s1504_s26 + $0x30] sm:$0xff] %v914_v31 }
 0x273   : > { %v683_v61 = vpop.f32.mrf.mxu3  ;;  %v712_v62 = vpop.f32.mrf.mxu1 }
 0x274   : > { %724 = vst [vmem:[%s423_s12] sm:$0xff] %v683_v61 }
 0x275   : > { %725 = vst [vmem:[%s423_s12 + $0x8] sm:$0xff] %v712_v62 }
 0x27b   : > { %v686_v20 = vpop.f32.mrf.mxu3  ;;  %v715_v12 = vpop.f32.mrf.mxu1 }
 0x27c   : > { %726 = vst [vmem:[%s423_s12 + $0x10] sm:$0xff] %v686_v20 }
 0x27d   : > { %727 = vst [vmem:[%s423_s12 + $0x18] sm:$0xff] %v715_v12 }
 0x283   : > { %v689_v19 = vpop.f32.mrf.mxu3  ;;  %v718_v63 = vpop.f32.mrf.mxu1 }
 0x284   : > { %728 = vst [vmem:[%s423_s12 + $0x20] sm:$0xff] %v689_v19 }
 0x285   : > { %729 = vst [vmem:[%s423_s12 + $0x28] sm:$0xff] %v718_v63 }
 0x28b   : > { %v692_v11 = vpop.f32.mrf.mxu3  ;;  %v721_v0 = vpop.f32.mrf.mxu1 }
 0x28c   : > { %730 = vst [vmem:[%s423_s12 + $0x30] sm:$0xff] %v692_v11 }
 0x28d   : > { %731 = vst [vmem:[%s423_s12 + $0x38] sm:$0xff] %v721_v0 }
 0x28e PF: > { %s19_s29 = sadd.s32 1, %s1322_s29   ;;  %s1571_s27 = smov %s1318_s28 }
 0x28f   : > { %p16_p5 = scmp.ge.s32.totalorder %s19_s29, 4   ;;  %s1572_s28 = smov %s1574_s30 }
 0x291   :  { %18 = sbr.rel (!%p16_p5) target bundleno = 2 (0x2), region = 112 }

</bundles_post_ra>
